<compile_context>
chip_gen: v7x
topology: tpu7x:2x2x1
jax: 0.10.0
libtpu: 0.0.40
codegen_flags: <defaults>
</compile_context>

<pallas_src>
import functools
import math

import jax
import jax.numpy as jnp
from jax.experimental import pallas as pl
from jax.experimental.pallas import tpu as pltpu


# ------------------------------------------------------------------ kernel ---
def fused_decoder_kernel(
    x_ref,        # (TM, H)   bf16  residue embeddings (row tile)
    mut_ref,      # (TM, H)   bf16  mutated residue embeddings (row tile)
    wcat_ref,     # (H, 128)  bf16  [statics | aa | 0-pad] weights, pre-transposed
    bcat_ref,     # (1, 128)  f32   [statics | aa | 0-pad] bias
    wef_ref,      # (H, 128)  bf16  [effect | 0-pad] weights, pre-transposed
    bef_ref,      # (1, 128)  f32   [effect | 0-pad] bias
    aa_lbl_ref,   # (TM, 1)   i32   argmax(batch.seq) labels (row tile)
    tgt_ref,      # (TM, C_st) f32  batch.target_static (row tile)
    ef_lbl_ref,   # (B, 1)    i32   batch.target_label
    combined_ref, # (TM, 128) bf16  out: [statics_out | aa_out | 0]
    effect_ref,   # (B, 128)  bf16  out: [effect_out | 0]   (written last step)
    loss_ref,     # (3,) f32  SMEM  out: [aa, statics, effect] (written last step)
    pooled_scr,   # (B, H)    f32   VMEM scratch: per-batch max of (mut - res)
    lsum_scr,     # (2,)      f32   SMEM scratch: running [aa CE sum, statics SSE]
    *, L, bpt, N, C_aa, C_st, C_eff,
):
    t = pl.program_id(0)
    TM = x_ref.shape[0]
    CPAD = combined_ref.shape[-1]
    NEG = jnp.float32(-1e30)

    # --- merged statics+aa decoder: one lane-dense bf16 MXU matmul, f32 acc ---
    x_bf = x_ref[...]                                            # (TM, H) bf16
    logits = (
        jnp.dot(x_bf, wcat_ref[...], preferred_element_type=jnp.float32)
        + bcat_ref[...]
    )                                                            # (TM, CPAD) f32
    combined_ref[...] = logits.astype(combined_ref.dtype)        # bf16 writeback

    # --- per-batch max pooling of (mut - res); tiles own disjoint batches -----
    diff = mut_ref[...].astype(jnp.float32) - x_bf.astype(jnp.float32)
    tile_pooled = jnp.max(diff.reshape(bpt, L, -1), axis=1)      # (bpt, H) f32
    pooled_scr[pl.ds(t * bpt, bpt), :] = tile_pooled

    # --- aa cross-entropy partial sum (labels are int32, one-hot via iota) ----
    col = jax.lax.broadcasted_iota(jnp.int32, (TM, CPAD), 1)
    aa_valid = (col >= C_st) & (col < C_st + C_aa)
    aa_masked = jnp.where(aa_valid, logits, NEG)                 # mask padded lanes
    m = jnp.max(aa_masked, axis=-1, keepdims=True)
    lse = m + jnp.log(jnp.sum(jnp.exp(aa_masked - m), axis=-1, keepdims=True))
    onehot = col == (aa_lbl_ref[...] + C_st)
    picked = jnp.sum(jnp.where(onehot, logits, 0.0), axis=-1, keepdims=True)
    aa_part = jnp.sum(lse - picked)

    # --- statics MSE partial sum (first C_st lanes of the combined slab) ------
    d = logits[:, 0:C_st] - tgt_ref[...]
    st_part = jnp.sum(d * d)

    @pl.when(t == 0)
    def _():
        lsum_scr[0] = jnp.float32(0.0)
        lsum_scr[1] = jnp.float32(0.0)

    lsum_scr[0] += aa_part
    lsum_scr[1] += st_part

    # --- finalize on the last tile: effect decoder + effect CE + loss means ---
    @pl.when(t == pl.num_programs(0) - 1)
    def _():
        B = pooled_scr.shape[0]
        pooled = pooled_scr[...]                                 # (B, H) f32
        eff = (
            jnp.dot(pooled.astype(jnp.bfloat16), wef_ref[...],
                    preferred_element_type=jnp.float32)
            + bef_ref[...]
        )                                                        # (B, CPAD) f32
        effect_ref[...] = eff.astype(effect_ref.dtype)

        colB = jax.lax.broadcasted_iota(jnp.int32, (B, CPAD), 1)
        ef_masked = jnp.where(colB < C_eff, eff, NEG)
        m2 = jnp.max(ef_masked, axis=-1, keepdims=True)
        lse2 = m2 + jnp.log(jnp.sum(jnp.exp(ef_masked - m2), axis=-1, keepdims=True))
        onehot2 = colB == ef_lbl_ref[...]
        picked2 = jnp.sum(jnp.where(onehot2, eff, 0.0), axis=-1, keepdims=True)

        loss_ref[0] = lsum_scr[0] * jnp.float32(1.0 / N)             # aa CE mean
        loss_ref[1] = lsum_scr[1] * jnp.float32(1.0 / (N * C_st))    # statics MSE
        loss_ref[2] = jnp.mean(lse2 - picked2)                       # effect CE mean


# ----------------------------------------------------- one-time weight pack --
def pack_decoder_params(params, hidden, c_aa, c_st, c_eff, cpad=128):
    """Transpose PyTorch-layout (out, in) weights, concatenate statics+aa,
    zero-pad the output axis to 128 lanes, and store the weights in bf16.
    Done ONCE outside the forward."""
    assert c_st + c_aa <= cpad and c_eff <= cpad
    w_cat = jnp.zeros((hidden, cpad), jnp.float32)
    w_cat = w_cat.at[:, :c_st].set(params["st_w"].T.astype(jnp.float32))
    w_cat = w_cat.at[:, c_st:c_st + c_aa].set(params["aa_w"].T.astype(jnp.float32))
    b_cat = jnp.zeros((1, cpad), jnp.float32)
    b_cat = b_cat.at[0, :c_st].set(params["st_b"].astype(jnp.float32))
    b_cat = b_cat.at[0, c_st:c_st + c_aa].set(params["aa_b"].astype(jnp.float32))
    w_ef = jnp.zeros((hidden, cpad), jnp.float32)
    w_ef = w_ef.at[:, :c_eff].set(params["ef_w"].T.astype(jnp.float32))
    b_ef = jnp.zeros((1, cpad), jnp.float32)
    b_ef = b_ef.at[0, :c_eff].set(params["ef_b"].astype(jnp.float32))
    return {"w_cat_t": w_cat.astype(jnp.bfloat16), "b_cat": b_cat,
            "w_ef_t": w_ef.astype(jnp.bfloat16), "b_ef": b_ef}


# ------------------------------------------------------------- tile chooser --
def _choose_row_tile(n_rows, seq_len, max_rows=1024):
    """Row tile: multiple of L (a batch never straddles a tile), multiple of 8
    (sublane rule) unless it covers all rows, and an exact divisor of N."""
    if n_rows <= max_rows:
        return n_rows
    base = (seq_len * 8) // math.gcd(seq_len, 8)        # lcm(L, 8)
    best = None
    m = base
    while m <= max_rows:
        if n_rows % m == 0:
            best = m
        m += base
    return best if best is not None else n_rows


# ------------------------------------------------------------ full forward ---
def bert_decoder_forward(packed, residue_embeddings, residue_mut_embeddings,
                         batch, *, c_aa, c_st, c_eff):
    B, L, H = residue_embeddings.shape
    N = B * L
    CPAD = packed["w_cat_t"].shape[1]

    TM = _choose_row_tile(N, L)
    T = N // TM
    bpt = TM // L                                        # batches per row tile

    # Embeddings stay in their native (bf16) dtype -> half the dominant DMA.
    x2d = residue_embeddings.reshape(N, H)
    mut2d = residue_mut_embeddings.reshape(N, H)
    aa_lbl = jnp.argmax(batch["seq"], axis=-1).reshape(N, 1).astype(jnp.int32)
    tgt2d = batch["target_static"].reshape(N, c_st).astype(jnp.float32)
    ef_lbl = batch["target_label"].reshape(B, 1).astype(jnp.int32)

    kernel = functools.partial(
        fused_decoder_kernel,
        L=L, bpt=bpt, N=N, C_aa=c_aa, C_st=c_st, C_eff=c_eff)

    row = lambda bs: pl.BlockSpec(bs, lambda t: (t, 0))
    const = lambda bs: pl.BlockSpec(bs, lambda t: (0, 0))

    flops = 2 * N * H * CPAD + 2 * B * H * CPAD
    transcendentals = (N + B) * CPAD
    bytes_accessed = (
        2 * N * H * 2                      # x + mut (bf16)
        + 2 * H * CPAD * 2 + 2 * CPAD * 4  # packed weights (bf16) + biases (f32)
        + N * 4 + N * c_st * 4 + B * 4     # labels + statics targets
        + N * CPAD * 2 + B * CPAD * 2 + 3 * 4)  # outputs

    combined, effect_pad, losses = pl.pallas_call(
        kernel,
        out_shape=(
            jax.ShapeDtypeStruct((N, CPAD), jnp.bfloat16),   # [statics | aa | 0]
            jax.ShapeDtypeStruct((B, CPAD), jnp.bfloat16),   # [effect | 0]
            jax.ShapeDtypeStruct((3,), jnp.float32),         # losses (SMEM)
        ),
        grid_spec=pltpu.PrefetchScalarGridSpec(
            num_scalar_prefetch=0,
            grid=(T,),
            in_specs=[
                row((TM, H)), row((TM, H)),                  # x, mut
                const((H, CPAD)), const((1, CPAD)),          # wcat, bcat
                const((H, CPAD)), const((1, CPAD)),          # wef, bef
                row((TM, 1)), row((TM, c_st)), const((B, 1)),  # labels, targets
            ],
            out_specs=(
                pl.BlockSpec((TM, CPAD), lambda t: (t, 0)),
                pl.BlockSpec((B, CPAD), lambda t: (0, 0)),
                pl.BlockSpec(memory_space=pltpu.MemorySpace.SMEM),
            ),
            scratch_shapes=[
                pltpu.VMEM((B, H), jnp.float32),             # pooled per-batch max
                pltpu.SMEM((2,), jnp.float32),               # loss partial sums
            ],
        ),
        # "arbitrary": loss/pool state is carried in scratch across row tiles.
        # TODO(synk): for v7x 2-TC sharding, emit per-tile partials + wrapper
        # reduce and mark this axis "parallel".
        compiler_params=pltpu.CompilerParams(
            dimension_semantics=("arbitrary",),
            vmem_limit_bytes=48 * 1024 * 1024),
        cost_estimate=pl.CostEstimate(
            flops=flops, transcendentals=transcendentals,
            bytes_accessed=bytes_accessed),
    )(x2d, mut2d, packed["w_cat_t"], packed["b_cat"],
      packed["w_ef_t"], packed["b_ef"], aa_lbl, tgt2d, ef_lbl)

    statics_out = combined[:, :c_st].reshape(B, L, c_st)
    aa_out = combined[:, c_st:c_st + c_aa].reshape(B, L, c_aa)
    effect_out = effect_pad[:, :c_eff]
    return aa_out, statics_out, effect_out, losses[0], losses[1], losses[2]


# ------------------------------------------------------- pure-JAX reference --
def reference_forward(params, res, mut, batch):
    # Mirror the kernel's deliberate mixed-precision choice (weights stored /
    # fed to the MXU in bf16) so the numeric check stays tight.
    q = lambda w: w.astype(jnp.bfloat16).astype(jnp.float32)
    res = res.astype(jnp.float32)
    mut = mut.astype(jnp.float32)
    aa_out = res @ q(params["aa_w"]).T + params["aa_b"]
    statics_out = res @ q(params["st_w"]).T + params["st_b"]
    pooled = jnp.max(mut - res, axis=1)
    effect_out = pooled @ q(params["ef_w"]).T + params["ef_b"]
    target_seq = jnp.argmax(batch["seq"], axis=-1)

    def ce(logits, labels):
        lse = jax.scipy.special.logsumexp(logits, axis=-1)
        picked = jnp.take_along_axis(logits, labels[:, None], axis=-1)[:, 0]
        return jnp.mean(lse - picked)

    aa_loss = ce(aa_out.reshape(-1, aa_out.shape[-1]), target_seq.reshape(-1))
    statics_loss = jnp.mean((statics_out - batch["target_static"]) ** 2)
    effect_loss = ce(effect_out, batch["target_label"])
    return aa_out, statics_out, effect_out, aa_loss, statics_loss, effect_loss


# ---------------------------------------------------------------------- main -
if __name__ == "__main__":
    B, L, H = 2, 8, 32
    C_AA, C_ST, C_EFF = 20, 4, 2

    key = jax.random.PRNGKey(0)
    keys = jax.random.split(key, 12)

    def lin_init(kw, kb, out_f, in_f):
        bound = 1.0 / (in_f ** 0.5)
        w = jax.random.uniform(kw, (out_f, in_f), jnp.float32, -bound, bound)
        b = jax.random.uniform(kb, (out_f,), jnp.float32, -bound, bound)
        return w, b

    aa_w, aa_b = lin_init(keys[0], keys[1], C_AA, H)
    st_w, st_b = lin_init(keys[2], keys[3], C_ST, H)
    ef_w, ef_b = lin_init(keys[4], keys[5], C_EFF, H)
    params = {"aa_w": aa_w, "aa_b": aa_b,
              "st_w": st_w, "st_b": st_b,
              "ef_w": ef_w, "ef_b": ef_b}

    # Embeddings in native bf16 (mixed-precision activations).
    residue_embeddings = jax.random.normal(
        keys[6], (B, L, H), jnp.float32).astype(jnp.bfloat16)
    residue_mut_embeddings = jax.random.normal(
        keys[7], (B, L, H), jnp.float32).astype(jnp.bfloat16)

    seq_idx = jax.random.randint(keys[8], (B, L), 0, C_AA)
    batch = {
        "seq": jax.nn.one_hot(seq_idx, C_AA, dtype=jnp.float32),
        "target_static": jax.random.normal(keys[9], (B, L, C_ST), jnp.float32),
        "target_label": jax.random.randint(keys[10], (B,), 0, C_EFF),
    }

    # weights packed ONCE (transpose + concat + 128-lane pad + bf16 cast)
    packed = pack_decoder_params(params, H, C_AA, C_ST, C_EFF)

    fwd = jax.jit(functools.partial(
        bert_decoder_forward, c_aa=C_AA, c_st=C_ST, c_eff=C_EFF))
    outs = fwd(packed, residue_embeddings, residue_mut_embeddings, batch)
    outs = jax.block_until_ready(outs)

    aa_out, statics_out, effect_out, aa_loss, statics_loss, effect_loss = outs
    assert aa_out.shape == (B, L, C_AA)
    assert statics_out.shape == (B, L, C_ST)
    assert effect_out.shape == (B, C_EFF)
    assert aa_loss.shape == () and statics_loss.shape == () and effect_loss.shape == ()

    # numeric check against a pure-JAX reference (bf16 MXU operands + bf16
    # logits writeback -> loose tolerances)
    ref = reference_forward(params, residue_embeddings, residue_mut_embeddings, batch)
    for got, want in zip(outs, ref):
        assert bool(jnp.allclose(got.astype(jnp.float32), want,
                                 rtol=1e-2, atol=1e-2)), (got, want)

    print("KERNEL_OK")
</pallas_src>

<mosaic_0001>
module attributes {stable_mosaic.version = 11 : i64} {
  func.func @fused_decoder_kernel(%arg0: i32, %arg1: memref<16x32xbf16, #tpu.memory_space<vmem>>, %arg2: memref<16x32xbf16, #tpu.memory_space<vmem>>, %arg3: memref<32x128xbf16, #tpu.memory_space<vmem>>, %arg4: memref<1x128xf32, #tpu.memory_space<vmem>>, %arg5: memref<32x128xbf16, #tpu.memory_space<vmem>>, %arg6: memref<1x128xf32, #tpu.memory_space<vmem>>, %arg7: memref<16x1xi32, #tpu.memory_space<vmem>>, %arg8: memref<16x4xf32, #tpu.memory_space<vmem>>, %arg9: memref<2x1xi32, #tpu.memory_space<vmem>>, %arg10: memref<16x128xbf16, #tpu.memory_space<vmem>>, %arg11: memref<2x128xbf16, #tpu.memory_space<vmem>>, %arg12: memref<3xf32, #tpu.memory_space<smem>>, %arg13: memref<2x32xf32, #tpu.memory_space<vmem>>, %arg14: memref<2xf32, #tpu.memory_space<smem>>) attributes {dimension_semantics = [#tpu.dimension_semantics<arbitrary>], iteration_bounds = array<i64: 1>, scalar_prefetch = 0 : i64, scratch_operands = 2 : i64, tpu.core_type = #tpu.core_type<tc>, window_params = [{transform_indices = @transform_0, window_bounds = array<i64: 16, 32>}, {transform_indices = @transform_1, window_bounds = array<i64: 16, 32>}, {pipeline_mode = #tpu.pipeline_mode<synchronous>, transform_indices = @transform_2, window_bounds = array<i64: 32, 128>}, {pipeline_mode = #tpu.pipeline_mode<synchronous>, transform_indices = @transform_3, window_bounds = array<i64: 1, 128>}, {pipeline_mode = #tpu.pipeline_mode<synchronous>, transform_indices = @transform_4, window_bounds = array<i64: 32, 128>}, {pipeline_mode = #tpu.pipeline_mode<synchronous>, transform_indices = @transform_5, window_bounds = array<i64: 1, 128>}, {transform_indices = @transform_6, window_bounds = array<i64: 16, 1>}, {transform_indices = @transform_7, window_bounds = array<i64: 16, 4>}, {pipeline_mode = #tpu.pipeline_mode<synchronous>, transform_indices = @transform_8, window_bounds = array<i64: 2, 1>}, {transform_indices = @transform_9, window_bounds = array<i64: 16, 128>}, {pipeline_mode = #tpu.pipeline_mode<synchronous>, transform_indices = @transform_10, window_bounds = array<i64: 2, 128>}, {transform_indices = @transform_11, window_bounds = array<i64: 3>}]} {
    %c0 = arith.constant 0 : index
    %c0_0 = arith.constant 0 : index
    %0 = vector.load %arg1[%c0, %c0_0] : memref<16x32xbf16, #tpu.memory_space<vmem>>, vector<16x32xbf16>
    %c0_1 = arith.constant 0 : index
    %c0_2 = arith.constant 0 : index
    %1 = vector.load %arg3[%c0_1, %c0_2] : memref<32x128xbf16, #tpu.memory_space<vmem>>, vector<32x128xbf16>
    %cst = arith.constant dense<0.000000e+00> : vector<16x128xf32>
    %2 = tpu.matmul %0, %1, %cst {dimension_numbers = #tpu.dot_dimension_numbers<[1], [0], [0], [1], [0, 0, 1, 1], [], []>} : vector<16x32xbf16>, vector<32x128xbf16>, vector<16x128xf32> -> vector<16x128xf32>
    %c0_3 = arith.constant 0 : index
    %c0_4 = arith.constant 0 : index
    %3 = vector.load %arg4[%c0_3, %c0_4] : memref<1x128xf32, #tpu.memory_space<vmem>>, vector<1x128xf32>
    %4 = vector.broadcast %3 : vector<1x128xf32> to vector<16x128xf32>
    %5 = arith.addf %2, %4 : vector<16x128xf32>
    %6 = arith.truncf %5 : vector<16x128xf32> to vector<16x128xbf16>
    %c0_5 = arith.constant 0 : index
    %c0_6 = arith.constant 0 : index
    %7 = vector.load %arg10[%c0_5, %c0_6] : memref<16x128xbf16, #tpu.memory_space<vmem>>, vector<16x128xbf16>
    tpu.vector_store %arg10[%c0_5, %c0_6], %6 {strides = array<i32>} : memref<16x128xbf16, #tpu.memory_space<vmem>>, vector<16x128xbf16>,
    %c0_7 = arith.constant 0 : index
    %c0_8 = arith.constant 0 : index
    %8 = vector.load %arg2[%c0_7, %c0_8] : memref<16x32xbf16, #tpu.memory_space<vmem>>, vector<16x32xbf16>
    %9 = arith.extf %8 : vector<16x32xbf16> to vector<16x32xf32>
    %10 = arith.extf %0 : vector<16x32xbf16> to vector<16x32xf32>
    %11 = arith.subf %9, %10 : vector<16x32xf32>
    %12 = vector.shape_cast %11 : vector<16x32xf32> to vector<2x8x32xf32>
    %cst_9 = arith.constant dense<0xFF800000> : vector<2x32xf32>
    %13 = vector.multi_reduction <maximumf>, %12, %cst_9 [1] : vector<2x8x32xf32> to vector<2x32xf32>
    %c2_i32 = arith.constant 2 : i32
    %14 = arith.muli %arg0, %c2_i32 : i32
    %15 = arith.index_cast %14 : i32 to index
    %c0_10 = arith.constant 0 : index
    %16 = vector.load %arg13[%15, %c0_10] : memref<2x32xf32, #tpu.memory_space<vmem>>, vector<2x32xf32>
    tpu.vector_store %arg13[%15, %c0_10], %13 {strides = array<i32>} : memref<2x32xf32, #tpu.memory_space<vmem>>, vector<2x32xf32>,
    %17 = tpu.iota {dimensions = array<i32: 1>} : vector<16x128xi32>
    %c4_i32 = arith.constant 4 : i32
    %18 = vector.broadcast %c4_i32 : i32 to vector<16x128xi32>
    %19 = arith.cmpi sge, %17, %18 : vector<16x128xi32>
    %c24_i32 = arith.constant 24 : i32
    %20 = vector.broadcast %c24_i32 : i32 to vector<16x128xi32>
    %21 = arith.cmpi slt, %17, %20 : vector<16x128xi32>
    %22 = arith.andi %19, %21 : vector<16x128xi1>
    %cst_11 = arith.constant -1.000000e+30 : f32
    %23 = vector.broadcast %cst_11 : f32 to vector<16x128xf32>
    %24 = arith.select %22, %5, %23 : vector<16x128xi1>, vector<16x128xf32>
    %cst_12 = arith.constant dense<0xFF800000> : vector<16xf32>
    %25 = vector.multi_reduction <maximumf>, %24, %cst_12 [1] : vector<16x128xf32> to vector<16xf32>
    %26 = vector.shape_cast %25 : vector<16xf32> to vector<16x1xf32>
    %27 = vector.broadcast %26 : vector<16x1xf32> to vector<16x128xf32>
    %28 = arith.subf %24, %27 : vector<16x128xf32>
    %29 = math.exp %28 : vector<16x128xf32>
    %cst_13 = arith.constant dense<0.000000e+00> : vector<16xf32>
    %30 = vector.multi_reduction <add>, %29, %cst_13 [1] : vector<16x128xf32> to vector<16xf32>
    %31 = vector.shape_cast %30 : vector<16xf32> to vector<16x1xf32>
    %32 = math.log %31 : vector<16x1xf32>
    %33 = arith.addf %26, %32 : vector<16x1xf32>
    %c0_14 = arith.constant 0 : index
    %c0_15 = arith.constant 0 : index
    %34 = vector.load %arg7[%c0_14, %c0_15] : memref<16x1xi32, #tpu.memory_space<vmem>>, vector<16x1xi32>
    %c4_i32_16 = arith.constant 4 : i32
    %35 = vector.broadcast %c4_i32_16 : i32 to vector<16x1xi32>
    %36 = arith.addi %34, %35 : vector<16x1xi32>
    %37 = vector.broadcast %36 : vector<16x1xi32> to vector<16x128xi32>
    %38 = arith.cmpi eq, %17, %37 : vector<16x128xi32>
    %cst_17 = arith.constant 0.000000e+00 : f32
    %39 = vector.broadcast %cst_17 : f32 to vector<16x128xf32>
    %40 = arith.select %38, %5, %39 : vector<16x128xi1>, vector<16x128xf32>
    %cst_18 = arith.constant dense<0.000000e+00> : vector<16xf32>
    %41 = vector.multi_reduction <add>, %40, %cst_18 [1] : vector<16x128xf32> to vector<16xf32>
    %42 = vector.shape_cast %41 : vector<16xf32> to vector<16x1xf32>
    %43 = arith.subf %33, %42 : vector<16x1xf32>
    %44 = vector.shape_cast %43 : vector<16x1xf32> to vector<1x16x1xf32>
    %cst_19 = arith.constant dense<0.000000e+00> : vector<1xf32>
    %45 = vector.multi_reduction <add>, %44, %cst_19 [1, 2] : vector<1x16x1xf32> to vector<1xf32>
    %46 = vector.shape_cast %45 : vector<1xf32> to vector<1x1x1xf32>
    %47 = vector.extract %46[0, 0, 0] : f32 from vector<1x1x1xf32>
    %48 = vector.extract_strided_slice %5 {offsets = [0, 0], sizes = [16, 4], strides = [1, 1]} : vector<16x128xf32> to vector<16x4xf32>
    %c0_20 = arith.constant 0 : index
    %c0_21 = arith.constant 0 : index
    %49 = vector.load %arg8[%c0_20, %c0_21] : memref<16x4xf32, #tpu.memory_space<vmem>>, vector<16x4xf32>
    %50 = arith.subf %48, %49 : vector<16x4xf32>
    %51 = arith.mulf %50, %50 : vector<16x4xf32>
    %52 = vector.shape_cast %51 : vector<16x4xf32> to vector<1x16x4xf32>
    %cst_22 = arith.constant dense<0.000000e+00> : vector<1xf32>
    %53 = vector.multi_reduction <add>, %52, %cst_22 [1, 2] : vector<1x16x4xf32> to vector<1xf32>
    %54 = vector.shape_cast %53 : vector<1xf32> to vector<1x1x1xf32>
    %55 = vector.extract %54[0, 0, 0] : f32 from vector<1x1x1xf32>
    %c0_i32 = arith.constant 0 : i32
    %56 = arith.cmpi eq, %arg0, %c0_i32 : i32
    %57 = arith.extui %56 : i1 to i32
    %c0_i32_23 = arith.constant 0 : i32
    %58 = arith.cmpi ne, %57, %c0_i32_23 : i32
    scf.if %58 {
      %cst_30 = arith.constant 0.000000e+00 : f32
      %c0_31 = arith.constant 0 : index
      %68 = memref.load %arg14[%c0_31] : memref<2xf32, #tpu.memory_space<smem>>
      memref.store %cst_30, %arg14[%c0_31] : memref<2xf32, #tpu.memory_space<smem>>
      %cst_32 = arith.constant 0.000000e+00 : f32
      %c1_33 = arith.constant 1 : index
      %69 = memref.load %arg14[%c1_33] : memref<2xf32, #tpu.memory_space<smem>>
      memref.store %cst_32, %arg14[%c1_33] : memref<2xf32, #tpu.memory_space<smem>>
    } else {
    }
    %c0_24 = arith.constant 0 : index
    %59 = memref.load %arg14[%c0_24] : memref<2xf32, #tpu.memory_space<smem>>
    %60 = arith.addf %59, %47 : f32
    %c0_25 = arith.constant 0 : index
    %61 = memref.load %arg14[%c0_25] : memref<2xf32, #tpu.memory_space<smem>>
    memref.store %60, %arg14[%c0_25] : memref<2xf32, #tpu.memory_space<smem>>
    %c1 = arith.constant 1 : index
    %62 = memref.load %arg14[%c1] : memref<2xf32, #tpu.memory_space<smem>>
    %63 = arith.addf %62, %55 : f32
    %c1_26 = arith.constant 1 : index
    %64 = memref.load %arg14[%c1_26] : memref<2xf32, #tpu.memory_space<smem>>
    memref.store %63, %arg14[%c1_26] : memref<2xf32, #tpu.memory_space<smem>>
    %c0_i32_27 = arith.constant 0 : i32
    %65 = arith.cmpi eq, %arg0, %c0_i32_27 : i32
    %66 = arith.extui %65 : i1 to i32
    %cst_28 = arith.constant -1.000000e+30 : f32
    %c0_i32_29 = arith.constant 0 : i32
    %67 = arith.cmpi ne, %66, %c0_i32_29 : i32
    scf.if %67 {
      %c0_30 = arith.constant 0 : index
      %c0_31 = arith.constant 0 : index
      %68 = vector.load %arg13[%c0_30, %c0_31] : memref<2x32xf32, #tpu.memory_space<vmem>>, vector<2x32xf32>
      %69 = arith.truncf %68 : vector<2x32xf32> to vector<2x32xbf16>
      %c0_32 = arith.constant 0 : index
      %c0_33 = arith.constant 0 : index
      %70 = vector.load %arg5[%c0_32, %c0_33] : memref<32x128xbf16, #tpu.memory_space<vmem>>, vector<32x128xbf16>
      %cst_34 = arith.constant dense<0.000000e+00> : vector<2x128xf32>
      %71 = tpu.matmul %69, %70, %cst_34 {dimension_numbers = #tpu.dot_dimension_numbers<[1], [0], [0], [1], [0, 0, 1, 1], [], []>} : vector<2x32xbf16>, vector<32x128xbf16>, vector<2x128xf32> -> vector<2x128xf32>
      %c0_35 = arith.constant 0 : index
      %c0_36 = arith.constant 0 : index
      %72 = vector.load %arg6[%c0_35, %c0_36] : memref<1x128xf32, #tpu.memory_space<vmem>>, vector<1x128xf32>
      %73 = vector.broadcast %72 : vector<1x128xf32> to vector<2x128xf32>
      %74 = arith.addf %71, %73 : vector<2x128xf32>
      %75 = arith.truncf %74 : vector<2x128xf32> to vector<2x128xbf16>
      %c0_37 = arith.constant 0 : index
      %c0_38 = arith.constant 0 : index
      %76 = vector.load %arg11[%c0_37, %c0_38] : memref<2x128xbf16, #tpu.memory_space<vmem>>, vector<2x128xbf16>
      tpu.vector_store %arg11[%c0_37, %c0_38], %75 {strides = array<i32>} : memref<2x128xbf16, #tpu.memory_space<vmem>>, vector<2x128xbf16>,
      %77 = tpu.iota {dimensions = array<i32: 1>} : vector<2x128xi32>
      %c2_i32_39 = arith.constant 2 : i32
      %78 = vector.broadcast %c2_i32_39 : i32 to vector<2x128xi32>
      %79 = arith.cmpi slt, %77, %78 : vector<2x128xi32>
      %80 = vector.broadcast %cst_28 : f32 to vector<2x128xf32>
      %81 = arith.select %79, %74, %80 : vector<2x128xi1>, vector<2x128xf32>
      %cst_40 = arith.constant dense<0xFF800000> : vector<2xf32>
      %82 = vector.multi_reduction <maximumf>, %81, %cst_40 [1] : vector<2x128xf32> to vector<2xf32>
      %83 = vector.shape_cast %82 : vector<2xf32> to vector<2x1xf32>
      %84 = vector.broadcast %83 : vector<2x1xf32> to vector<2x128xf32>
      %85 = arith.subf %81, %84 : vector<2x128xf32>
      %86 = math.exp %85 : vector<2x128xf32>
      %cst_41 = arith.constant dense<0.000000e+00> : vector<2xf32>
      %87 = vector.multi_reduction <add>, %86, %cst_41 [1] : vector<2x128xf32> to vector<2xf32>
      %88 = vector.shape_cast %87 : vector<2xf32> to vector<2x1xf32>
      %89 = math.log %88 : vector<2x1xf32>
      %90 = arith.addf %83, %89 : vector<2x1xf32>
      %c0_42 = arith.constant 0 : index
      %c0_43 = arith.constant 0 : index
      %91 = vector.load %arg9[%c0_42, %c0_43] : memref<2x1xi32, #tpu.memory_space<vmem>>, vector<2x1xi32>
      %92 = vector.broadcast %91 : vector<2x1xi32> to vector<2x128xi32>
      %93 = arith.cmpi eq, %77, %92 : vector<2x128xi32>
      %cst_44 = arith.constant 0.000000e+00 : f32
      %94 = vector.broadcast %cst_44 : f32 to vector<2x128xf32>
      %95 = arith.select %93, %74, %94 : vector<2x128xi1>, vector<2x128xf32>
      %cst_45 = arith.constant dense<0.000000e+00> : vector<2xf32>
      %96 = vector.multi_reduction <add>, %95, %cst_45 [1] : vector<2x128xf32> to vector<2xf32>
      %97 = vector.shape_cast %96 : vector<2xf32> to vector<2x1xf32>
      %c0_46 = arith.constant 0 : index
      %98 = memref.load %arg14[%c0_46] : memref<2xf32, #tpu.memory_space<smem>>
      %cst_47 = arith.constant 6.250000e-02 : f32
      %99 = arith.mulf %98, %cst_47 : f32
      %c0_48 = arith.constant 0 : index
      %100 = memref.load %arg12[%c0_48] : memref<3xf32, #tpu.memory_space<smem>>
      memref.store %99, %arg12[%c0_48] : memref<3xf32, #tpu.memory_space<smem>>
      %c1_49 = arith.constant 1 : index
      %101 = memref.load %arg14[%c1_49] : memref<2xf32, #tpu.memory_space<smem>>
      %cst_50 = arith.constant 1.562500e-02 : f32
      %102 = arith.mulf %101, %cst_50 : f32
      %c1_51 = arith.constant 1 : index
      %103 = memref.load %arg12[%c1_51] : memref<3xf32, #tpu.memory_space<smem>>
      memref.store %102, %arg12[%c1_51] : memref<3xf32, #tpu.memory_space<smem>>
      %104 = arith.subf %90, %97 : vector<2x1xf32>
      %105 = vector.shape_cast %104 : vector<2x1xf32> to vector<1x2x1xf32>
      %cst_52 = arith.constant dense<0.000000e+00> : vector<1xf32>
      %106 = vector.multi_reduction <add>, %105, %cst_52 [1, 2] : vector<1x2x1xf32> to vector<1xf32>
      %107 = vector.shape_cast %106 : vector<1xf32> to vector<1x1x1xf32>
      %108 = vector.extract %107[0, 0, 0] : f32 from vector<1x1x1xf32>
      %cst_53 = arith.constant 2.000000e+00 : f32
      %109 = arith.divf %108, %cst_53 : f32
      %c2 = arith.constant 2 : index
      %110 = memref.load %arg12[%c2] : memref<3xf32, #tpu.memory_space<smem>>
      memref.store %109, %arg12[%c2] : memref<3xf32, #tpu.memory_space<smem>>
    } else {
    }
    return
  }
  func.func @transform_0(%arg0: i32) -> (i32, i32) {
    %c0_i32 = arith.constant 0 : i32
    %c0_i32_0 = arith.constant 0 : i32
    return %arg0, %c0_i32 : i32, i32
  }
  func.func @transform_1(%arg0: i32) -> (i32, i32) {
    %c0_i32 = arith.constant 0 : i32
    %c0_i32_0 = arith.constant 0 : i32
    return %arg0, %c0_i32 : i32, i32
  }
  func.func @transform_2(%arg0: i32) -> (i32, i32) {
    %c0_i32 = arith.constant 0 : i32
    %c0_i32_0 = arith.constant 0 : i32
    %c0_i32_1 = arith.constant 0 : i32
    return %c0_i32, %c0_i32_0 : i32, i32
  }
  func.func @transform_3(%arg0: i32) -> (i32, i32) {
    %c0_i32 = arith.constant 0 : i32
    %c0_i32_0 = arith.constant 0 : i32
    %c0_i32_1 = arith.constant 0 : i32
    return %c0_i32, %c0_i32_0 : i32, i32
  }
  func.func @transform_4(%arg0: i32) -> (i32, i32) {
    %c0_i32 = arith.constant 0 : i32
    %c0_i32_0 = arith.constant 0 : i32
    %c0_i32_1 = arith.constant 0 : i32
    return %c0_i32, %c0_i32_0 : i32, i32
  }
  func.func @transform_5(%arg0: i32) -> (i32, i32) {
    %c0_i32 = arith.constant 0 : i32
    %c0_i32_0 = arith.constant 0 : i32
    %c0_i32_1 = arith.constant 0 : i32
    return %c0_i32, %c0_i32_0 : i32, i32
  }
  func.func @transform_6(%arg0: i32) -> (i32, i32) {
    %c0_i32 = arith.constant 0 : i32
    %c0_i32_0 = arith.constant 0 : i32
    return %arg0, %c0_i32 : i32, i32
  }
  func.func @transform_7(%arg0: i32) -> (i32, i32) {
    %c0_i32 = arith.constant 0 : i32
    %c0_i32_0 = arith.constant 0 : i32
    return %arg0, %c0_i32 : i32, i32
  }
  func.func @transform_8(%arg0: i32) -> (i32, i32) {
    %c0_i32 = arith.constant 0 : i32
    %c0_i32_0 = arith.constant 0 : i32
    %c0_i32_1 = arith.constant 0 : i32
    return %c0_i32, %c0_i32_0 : i32, i32
  }
  func.func @transform_9(%arg0: i32) -> (i32, i32) {
    %c0_i32 = arith.constant 0 : i32
    %c0_i32_0 = arith.constant 0 : i32
    return %arg0, %c0_i32 : i32, i32
  }
  func.func @transform_10(%arg0: i32) -> (i32, i32) {
    %c0_i32 = arith.constant 0 : i32
    %c0_i32_0 = arith.constant 0 : i32
    %c0_i32_1 = arith.constant 0 : i32
    return %c0_i32, %c0_i32_0 : i32, i32
  }
  func.func @transform_11(%arg0: i32) -> i32 {
    %c0_i32 = arith.constant 0 : i32
    %c0_i32_0 = arith.constant 0 : i32
    return %c0_i32 : i32
  }
}

</mosaic_0001>

<bundles_post_ra>
// kernel: bert_decoder_forward.1
= control target key start
LH: loop header
LB: loop body
LE: loop exit
PB: predicated region body
PF: predicated region fallthrough
CT: control target
= control target key end

     0   :  { %17 = vsyncpa [#allocation5], 0  ;;  %v519_v1 = vmov 0.0   ;;  %vm520_vm0 = vmmov 0   ;;  %vm68_vm1 = vcmask 261120   ;;  %v521_v13 = vmov 0   ;;  %s668_s0 = inlined_call_operand.vmem [shape: bf16[16,32], index: 0, kind: input, shape index: {}]   ;;  %s669_s1 = inlined_call_operand.vmem [shape: bf16[16,32], index: 1, kind: input, shape index: {}]   ;;  %s670_s2 = inlined_call_operand.vmem [shape: bf16[32,128], index: 2, kind: input, shape index: {}]   ;;  %s671_s3 = inlined_call_operand.vmem [shape: f32[1,128], index: 3, kind: input, shape index: {}]   ;;  %s672_s4 = inlined_call_operand.vmem [shape: bf16[32,128], index: 4, kind: input, shape index: {}]   ;;  %s673_s5 = inlined_call_operand.vmem [shape: f32[1,128], index: 5, kind: input, shape index: {}]   ;;  %s674_s6 = inlined_call_operand.vmem [shape: s32[16,1], index: 6, kind: input, shape index: {}]   ;;  %s675_s7 = inlined_call_operand.vmem [shape: f32[16,4], index: 7, kind: input, shape index: {}]   ;;  %s676_s8 = inlined_call_operand.vmem [shape: s32[2,1], index: 8, kind: input, shape index: {}]   ;;  %s677_s9 = inlined_call_operand.vmem [shape: bf16[16,128], index: 9, kind: output, shape index: {0}]   ;;  %s678_s10 = inlined_call_operand.hbm [shape: bf16[2,128], index: 10, kind: output, shape index: {1}]   ;;  %s679_s11 = inlined_call_operand.vmem [shape: f32[3], index: 11, kind: output, shape index: {2}]  }
   0x1   :  { %v463_v0 = vld [vmem:[%s670_s2] sm:$0xff]   ;;  %434 = vmatprep.subr.bf16.mxu0 %v519_v1  ;;  %v464_v2 = vld [vmem:[%s670_s2 + $0x8] sm:$0xff]   ;;  %442 = vmatprep.subr.bf16.mxu1 %v519_v1 }
   0x2   :  { %435 = vmatpush3.bf16.msra.mxu0 %v463_v0  ;;  %438 = vmatprep.mubr.msk.bf16.mxu0 %vm520_vm0, %v519_v1  ;;  %v38_v3 = vld [vmem:[%s668_s0] sm:$0xff]   ;;  %v467_v10 = vld [vmem:[%s672_s4 + $0x8] sm:$0xff]  }
   0x3   :  { %v425_v4 = vld [vmem:[%s669_s1] sm:$0xff]   ;;  %436 = vmatprep.subr.bf16.mxu0 %v519_v1  ;;  %v127_v8 = vunpack.c.l.bf16 %v38_v3  ;;  %446 = vmatprep.mubr.msk.bf16.mxu1 %vm520_vm0, %v519_v1  ;;  %v128_v9 = vunpack.c.h.bf16 %v38_v3 }
   0x4   :  { %v466_v5 = vld [vmem:[%s672_s4] sm:$0xff]   ;;  %v426_v6 = vunpack.c.l.bf16 %v425_v4  ;;  %v427_v7 = vunpack.c.h.bf16 %v425_v4  ;;  %461 = vset.pattern.permute.xlu1 %v521_v13 }
   0x5   :  { %443 = vmatpush3.bf16.msra.mxu1 %v466_v5  ;;  %v181_v11 = vld [vmem:[%s674_s6] sm:$0xff] }
   0x6   :  { %v129_v12 = vsub.f32 %v426_v6, %v127_v8  ;;  %444 = vmatprep.subr.bf16.mxu1 %v519_v1  ;;  %v183_v14 = vadd.s32 4, %v181_v11 }
   0x7   :  { %18 = vsyncpa [#allocation6], 0  ;;  %437 = vmatpush3.bf16.msra.mxu0 %v464_v2  ;;  %v130_v15 = vsub.f32 %v427_v7, %v128_v9  ;;  %462 = vset.pattern.permute.xlu0 %v521_v13  ;;  %vm148_vm2 = vcmask 1041409   ;;  %vm152_vm3 = vcmask 254976   ;;  %v154_v33 = vlaneseq  ;;  %v404_v35 = vld [vmem:[%s671_s3] ss:$0 sm:$0xff] }
   0x8   :  { %v131_v16 = vsel %vm68_vm1, %v129_v12, -inf  ;;  %186 = vperm.xlu1 %461, %v183_v14   ;;  %v412_v45 = vld [vmem:[%s673_s5] ss:$0 sm:$0xff]  ;;  %v182_v47 = vld [vmem:[%s674_s6 + $0x8] sm:$0xff]  ;;  %vm324_vm8 = vcmask 1041408   ;;  %vm201_vm12 = vcmask 7168  }
   0x9   :  { %v132_v17 = vrot.slane %v131_v16, 4  ;;  %v138_v18 = vsel %vm68_vm1, %v130_v15, -inf  ;;  %445 = vmatpush3.bf16.msra.mxu1 %v467_v10  ;;  %v609_v34 = vand.u32 127, %v154_v33  ;;  %v184_v53 = vadd.s32 4, %v182_v47  ;;  %v337_v56 = vld [vmem:[%s676_s8] sm:$0x3] }
   0xa   :  { %439 = vmatmul.mubr.msk.bf16.vlgmr.msra.gmra.mrb[0].mxu0 %vm68_vm1, %v38_v3  ;;  %v139_v19 = vrot.slane %v138_v18, 4  ;;  %vm220_vm13 = vcmask 31744   ;;  %vm355_vm14 = vcmask 1024  }
   0xb   :  { %v133_v20 = vmax.f32 %v131_v16, %v132_v17  ;;  %vm156_vm4 = vcmp.ge.s32.totalorder %v609_v34, 4  ;;  %vm157_vm5 = vcmp.lt.s32.totalorder %v609_v34, 24  ;;  %vm322_vm7 = vcmp.lt.s32.totalorder %v609_v34, 2 }
   0xc   :  { %v140_v21 = vmax.f32 %v138_v18, %v139_v19  ;;  %vm158_vm6 = vmand %vm156_vm4, %vm157_vm5  ;;  %v214_v19 = vld [vmem:[%s675_s7] sm:$0xff] }
   0xd   :  { %v134_v22 = vrot.slane %v133_v20, 2 }
   0xe   :  { %v141_v23 = vrot.slane %v140_v21, 2 }
   0xf   :  { %v135_v24 = vmax.f32 %v133_v20, %v134_v22  ;;  %v215_v20 = vld [vmem:[%s675_s7 + $0x8] sm:$0xff]  ;;  %s522_s7 = smov [#allocation4]  }
  0x10   :  { %v142_v25 = vmax.f32 %v140_v21, %v141_v23  ;;  %s379_s17 = sshll.u32 %s522_s7, 4  ;;  %s380_s17 = int_to_ptr.vmem [resolvable:$true] %s379_s17 }
  0x11   :  { %v136_v26 = vrot.slane %v135_v24, 1  ;;  %s481_s18 = scalar_lea.vmem %s380_s17, 16  ;;  %s485_s19 = scalar_lea.vmem %s380_s17, 32 }
  0x12   :  { %v143_v27 = vrot.slane %v142_v25, 1  ;;  %p482_p0 = scmp.ne.s32.totalorder %s380_s17, %s481_s18  ;;  %p486_p1 = scmp.lt.s32.totalorder %s380_s17, %s380_s17 }
  0x13   :  { %v137_v28 = vmax.f32 %v135_v24, %v136_v26  ;;  %p487_p2 = scmp.lt.s32.totalorder %s485_s19, %s481_s18 }
  0x14   :  { %v144_v29 = vmax.f32 %v142_v25, %v143_v27 }
  0x15   :  { %p488_p3 = por %p487_p2, %p486_p1 }
  0x16   :  { %v149_v30 = vsel %vm148_vm2, %v144_v29, %v137_v28 }
  0x17   :  { %153 = vst.msk [vmem:[#allocation2] sm:$0x3] %vm152_vm3, %v149_v30  ;;  %p489_p4 = pnand %p488_p3, %p482_p0 }
  0x1e   :  { %v252_v31 = vld [vmem:[#allocation2] sm:$0x3] }
  0x1f   :  { %v253_v32 = vpack.c.bf16 %v252_v31, %v252_v31 }
  0x21   :  { %447 = vmatmul.mubr.msk.bf16.vlgmr.msra.gmra.mrb[0].mxu1 %vm68_vm1, %v253_v32 }
  0x87   :  { %v187_v1 = vpop.permute.xlu1 %186 }
  0x88   :  { %vm191_vm9 = vcmp.eq.s32.totalorder %v609_v34, %v187_v1 }
  0xdd   :  { %v106_v36 = vpop.f32.mrb[0].mxu0 }
  0xde   :  { %v616_v37 = vadd.f32 %v404_v35, %v106_v36  ;;  %v440_v38 = vpop.f32.mrb[1].mxu0 }
  0xdf   :  { %v109_v39 = vpop.f32.mrb[2].mxu0 }
  0xe0   :  { %v159_v40 = vsel %vm158_vm6, %v616_v37, -1e+30  ;;  %v619_v41 = vadd.f32 %v404_v35, %v109_v39  ;;  %v441_v42 = vpop.f32.mrb[3].mxu0  ;;  %v193_v9 = vsel %vm191_vm9, %v616_v37, 0.0  ;;  %v216_v24 = vsub.f32 %v616_v37, %v214_v19 }
  0xe1   :  { %161 = vmax.xlane.f32.xlu0 %v159_v40 }
  0xe2   :  { %v422_v43 = vpack.c.bf16 %v619_v41, %v616_v37  ;;  %v160_v44 = vsel %vm158_vm6, %v619_v41, -1e+30  ;;  %v217_v25 = vsub.f32 %v619_v41, %v215_v20  ;;  %v218_v30 = vmul.f32 %v216_v24, %v216_v24 }
  0xe4   :  { %423 = vst [vmem:[%s677_s9] sm:$0xff] %v422_v43   ;;  %v219_v31 = vmul.f32 %v217_v25, %v217_v25  ;;  %v221_v38 = vsel %vm220_vm13, %v218_v30, 0.0 }
  0xe5   :  { %163 = vmax.xlane.f32.xlu0 %v160_v44 }
  0xe6   :  { %v222_v39 = vsel %vm220_vm13, %v219_v31, 0.0 }
  0xe7   :  { %v223_v42 = vadd.f32 %v222_v39, %v221_v38 }
  0xf4   :  { %v314_v46 = vpop.f32.mrb[0].mxu1 }
  0xf5   :  { %v315_v48 = vadd.f32 %v412_v45, %v314_v46  ;;  %v448_v49 = vpop.f32.mrb[1].mxu1 }
  0xf6   :  { %v317_v50 = vpop.f32.mrb[2].mxu1 }
  0xf7   :  { %v449_v51 = vpop.f32.mrb[3].mxu1  ;;  %v323_v52 = vsel %vm322_vm7, %v315_v48, -1e+30  ;;  %v320_v54 = vpack.c.bf16 %v315_v48, %v315_v48 }
  0xf8   :  { %v325_v55 = vsel %vm324_vm8, %v323_v52, -inf }
  0xf9   :  { %326 = vmax.xlane.f32.xlu1 %v325_v55  ;;  %321 = vst [vmem:[#allocation4] sm:$0x1] %v320_v54 }
  0xfb   :  { %189 = vperm.xlu0 %462, %v184_v53  }
 0x10a   :  { %339 = vperm.xlu1 %461, %v337_v56  }
 0x16e   :  { %v162_v57 = vpop.xlane.xlu0 %161 }
 0x16f   :  { %v165_v58 = vsub.f32 %v159_v40, %v162_v57 }
 0x171   :  { %v167_v59 = vmul.f32 1.442695, %v165_v58 }
 0x172   :  { %v164_v60 = vpop.xlane.xlu0 %163 }
 0x173   :  { %469 = vpow2.f32 %v167_v59  ;;  %v166_v61 = vsub.f32 %v160_v44, %v164_v60 }
 0x175   :  { %v169_v62 = vmul.f32 1.442695, %v166_v61 }
 0x177   :  { %471 = vpow2.f32 %v169_v62 }
 0x17a   :  { %v190_v7 = vpop.permute.xlu0 %189 }
 0x17b   :  { %vm192_vm10 = vcmp.eq.s32.totalorder %v609_v34, %v190_v7 }
 0x17c   :  { %v194_v10 = vsel %vm192_vm10, %v619_v41, 0.0 }
 0x17d   :  { %v470_v63 = vpop.eup %469 }
 0x17e   :  { %171 = vadd.xlane.f32.xlu1 %v470_v63 }
 0x181   :  { %v472_v0 = vpop.eup %471 }
 0x182   :  { %173 = vadd.xlane.f32.xlu0 %v472_v0 }
 0x186   :  { %v327_v2 = vpop.xlane.xlu1 %326 }
 0x187   :  { %v328_v3 = vsub.f32 %v323_v52, %v327_v2 }
 0x189   :  { %v329_v4 = vmul.f32 1.442695, %v328_v3 }
 0x18a   :  { %v340_v8 = vpop.permute.xlu1 %339 }
 0x18b   :  { %473 = vpow2.f32 %v329_v4  ;;  %vm341_vm11 = vcmp.eq.s32.totalorder %v609_v34, %v340_v8 }
 0x18c   :  { %v342_v11 = vsel %vm341_vm11, %v315_v48, 0.0 }
 0x18d   :  { %v343_v12 = vsel %vm324_vm8, %v342_v11, 0.0 }
 0x195   :  { %v474_v5 = vpop.eup %473 }
 0x196   :  { %v331_v6 = vsel %vm324_vm8, %v474_v5, 0.0 }
 0x197   :  { %332 = vadd.xlane.f32.xlu1 %v331_v6 }
 0x19b   :  { %195 = vadd.xlane.f32.xlu1 %v193_v9 }
 0x19f   :  { %197 = vadd.xlane.f32.xlu1 %v194_v10 }
 0x1a3   :  { %344 = vadd.xlane.f32.xlu1 %v343_v12 }
 0x20b   :  { %v172_v13 = vpop.xlane.xlu1 %171 }
 0x20c   :  { %475 = vlog2.f32 %v172_v13 }
 0x20f   :  { %v174_v14 = vpop.xlane.xlu0 %173 }
 0x210   :  { %477 = vlog2.f32 %v174_v14 }
 0x216   :  { %v476_v15 = vpop.eup %475 }
 0x217   :  { %v176_v18 = vmul.f32 0.6931472, %v476_v15 }
 0x219   :  { %v179_v23 = vadd.f32 %v176_v18, %v162_v57 }
 0x21a   :  { %v478_v16 = vpop.eup %477 }
 0x21b   :  { %v178_v21 = vmul.f32 0.6931472, %v478_v16 }
 0x21d   :  { %v180_v27 = vadd.f32 %v178_v21, %v164_v60 }
 0x224   :  { %v333_v17 = vpop.xlane.xlu1 %332 }
 0x225   :  { %479 = vlog2.f32 %v333_v17 }
 0x228   :  { %v196_v22 = vpop.xlane.xlu1 %195 }
 0x229   :  { %v199_v26 = vsub.f32 %v179_v23, %v196_v22 }
 0x22b   :  { %v202_v33 = vsel %vm201_vm12, %v199_v26, 0.0 }
 0x22c   :  { %v198_v28 = vpop.xlane.xlu1 %197 }
 0x22d   :  { %v200_v29 = vsub.f32 %v180_v27, %v198_v28 }
 0x22f   :  { %v480_v32 = vpop.eup %479  ;;  %v203_v34 = vsel %vm201_vm12, %v200_v29, 0.0 }
 0x230   :  { %v335_v35 = vmul.f32 0.6931472, %v480_v32  ;;  %v204_v36 = vadd.f32 %v203_v34, %v202_v33  ;;  %v345_v37 = vpop.xlane.xlu1 %344 }
 0x232   :  { %v336_v40 = vadd.f32 %v335_v35, %v327_v2  ;;  %205 = vadd.xlane.f32.xlu1 %v204_v36 }
 0x234   :  { %v354_v41 = vsub.f32 %v336_v40, %v345_v37 }
 0x236   :  { %224 = vadd.xlane.f32.xlu1 %v223_v42  ;;  %v356_v43 = vsel %vm355_vm14, %v354_v41, 0.0 }
 0x237   :  { %357 = vadd.xlane.f32.xlu0 %v356_v43 }
 0x238   :  { %492 = shalt.err (!%p489_p4)
}
 0x239   :  { %s493_s22 = scalar_lea.hbm %s678_s10, 16 }
 0x23a   :  { %p494_p5 = scmp.ne.s32.totalorder %s678_s10, %s493_s22  ;;  %p497_p6 = scmp.lt.u32.totalorder %s493_s22, %s678_s10 }
 0x23c   :  { %p499_p7 = pnand %p497_p6, %p494_p5 }
 0x23e   :  { %502 = shalt.err (!%p499_p7)
}
 0x23f   :  { %382 = dma.vmem_to_hbm [thread:$0]  %s380_s17, 16, %s678_s10, [#allocation5]  }
 0x240   :  { %s389_s4 = sshll.u32 %s679_s11, 4  ;;  %s390_s4 = int_to_ptr.vmem [resolvable:$true] %s389_s4 }
 0x241   :  { %s503_s13 = scalar_lea.vmem %s390_s4, 16  ;;  %p508_p9 = scmp.lt.s32.totalorder %s390_s4, %s390_s4 }
 0x242   :  { %p504_p8 = scmp.ne.s32.totalorder %s390_s4, %s503_s13  ;;  %p509_p10 = scmp.lt.s32.totalorder %s503_s13, %s503_s13 }
 0x244   :  { %p510_p11 = por %p509_p10, %p508_p9 }
 0x246   :  { %p511_p12 = pnand %p510_p11, %p504_p8 }
 0x2bf   :  { %v206_v44 = vpop.xlane.xlu1 %205 }
 0x2c0   :  { %v207_v45 = vrot.slane %v206_v44, 4 }
 0x2c2   :  { %v208_v46 = vadd.f32 %v207_v45, %v206_v44 }
 0x2c3   :  { %v225_v47 = vpop.xlane.xlu1 %224 }
 0x2c4   :  { %v209_v48 = vrot.slane %v208_v46, 2  ;;  %v226_v49 = vrot.slane %v225_v47, 4  ;;  %v358_v50 = vpop.xlane.xlu0 %357 }
 0x2c5   :  { %v359_v51 = vrot.slane %v358_v50, 4 }
 0x2c6   :  { %v227_v52 = vadd.f32 %v226_v49, %v225_v47  ;;  %v210_v53 = vadd.f32 %v209_v48, %v208_v46 }
 0x2c7   :  { %v360_v54 = vadd.f32 %v359_v51, %v358_v50 }
 0x2c8   :  { %v228_v55 = vrot.slane %v227_v52, 2  ;;  %v211_v56 = vrot.slane %v210_v53, 1 }
 0x2c9   :  { %v361_v57 = vrot.slane %v360_v54, 2 }
 0x2ca   :  { %v229_v58 = vadd.f32 %v228_v55, %v227_v52  ;;  %v212_v59 = vadd.f32 %v211_v56, %v210_v53 }
 0x2cb   :  { %v362_v60 = vadd.f32 %v361_v57, %v360_v54 }
 0x2cc   :  { %450 = vpush %v212_v59  ;;  %v230_v61 = vrot.slane %v229_v58, 1 }
 0x2cd   :  { %v363_v62 = vrot.slane %v362_v60, 1 }
 0x2ce   :  { %v231_v63 = vadd.f32 %v230_v61, %v229_v58 }
 0x2cf   :  { %v364_v0 = vadd.f32 %v363_v62, %v362_v60 }
 0x2d0   :  { %452 = vpush %v231_v63 }
 0x2d1   :  { %454 = vpush %v364_v0 }
 0x2fd   :  { %s451_s10 = spop %450 }
 0x2fe   :  { %s347_s0 = smul.f32 0.0625, %s451_s10 }
 0x300   :  { %349 = sst [smem:[#allocation7]] %s347_s0 }
 0x301   :  { %s453_s29 = spop %452 }
 0x302   :  { %s351_s30 = smul.f32 0.015625, %s453_s29  ;;  %s455_s3 = spop %454 }
 0x303   :  { %s368_s12 = smul.f32 0.5, %s455_s3 }
 0x304   :  { %353 = sst [smem:[#allocation7 + $0x1]] %s351_s30 }
 0x305   :  { %370 = sst [smem:[#allocation7 + $0x2]] %s368_s12 }
 0x306   :  { %514 = shalt.err (!%p511_p12)
}
 0x307   :  { %s523_s14 = smov [#allocation7]  }
 0x308   :  { %392 = dma.smem_to_vmem %s523_s14, 16, %s390_s4, [#allocation6]  }
 0x309   :  { %515 = dma.done.wait [#allocation5], 16  }
 0x30a   :  { %516 = vsyncadd [#allocation5], 4294967280 }
 0x30b   :  { %517 = dma.done.wait [#allocation6], 16  }
 0x30c   :  { %518 = vsyncadd [#allocation6], 4294967280 }
 0x30d   :  { %401 = sfence }
 0x30e   :  { %402 = vsyncpa [#allocation5], 1 }
 0x30f   :  { %403 = vsyncpa [#allocation6], 1 }

</bundles_post_ra>
